<compile_context>
chip_gen: v7x
topology: tpu7x:2x2x1
jax: 0.10.0
libtpu: 0.0.40
codegen_flags: <defaults>
</compile_context>

<pallas_src>
import jax
import jax.numpy as jnp
from jax.experimental import pallas as pl
from jax.experimental.pallas import tpu as pltpu


def _round_up(x, m):
    return (x + m - 1) // m * m


def _make_kernel(b_tile, n_tile, d_in, d_hid_p, n_valid, n_padded, compute_dtype):
    need_mask = n_padded != n_valid

    def kernel(x_ref, w1_ref, b1_ref, w2_ref, b2_ref, o_ref, acc_ref):
        k = pl.program_id(1)

        @pl.when(k == 0)
        def _init():
            acc_ref[...] = jnp.zeros_like(acc_ref)

        # Per-element encoder (Linear + ReLU) on this (b_tile, n_tile) chunk.
        x2 = x_ref[...].reshape(b_tile * n_tile, d_in)          # bf16
        h = jnp.dot(x2, w1_ref[...], preferred_element_type=jnp.float32)
        h = jnp.maximum(h + b1_ref[...], 0.0)                   # f32 (b*n, d_hid_p)
        h3 = h.reshape(b_tile, n_tile, d_hid_p)

        if need_mask:
            # Zero the contribution of set elements that are pure N-padding
            # (padded x rows would otherwise contribute ReLU(b1)).
            n_idx = jax.lax.broadcasted_iota(jnp.int32, h3.shape, 1)
            h3 = jnp.where(k * n_tile + n_idx < n_valid, h3, 0.0)

        # Set-sum over this chunk, accumulated in the f32 scratch.
        acc_ref[...] += jnp.sum(h3, axis=1)

        @pl.when(k == pl.num_programs(1) - 1)
        def _finalize():
            # Aggregator (Linear + ReLU) once per batch tile, f32 epilogue.
            out = jnp.dot(acc_ref[...], w2_ref[...].astype(jnp.float32),
                          preferred_element_type=jnp.float32)
            o_ref[...] = jnp.maximum(out + b2_ref[...], 0.0)

    return kernel


def set_encoder_forward(x, w1, b1, w2, b2, *, b_tile=64, n_tile=256):
    """x: (B, N, d_in) float -> (B, d_out) float32 (matches SetEncoder.forward)."""
    compute_dtype = jnp.bfloat16
    f32 = jnp.float32

    B, N, d_in = x.shape
    d_hid = w1.shape[1]
    d_out = w2.shape[1]

    # Lane-dense feature padding for h / agg / out.
    d_hid_p = _round_up(d_hid, 128)
    d_out_p = _round_up(d_out, 128)

    # Tile sizes: multiples of 8 (sublane), clamped to the padded extents.
    b_tile = min(_round_up(b_tile, 8), _round_up(B, 8))
    n_tile = min(_round_up(n_tile, 8), _round_up(N, 8))
    B_p = _round_up(B, b_tile)
    N_p = _round_up(N, n_tile)
    b_grid = B_p // b_tile
    n_grid = N_p // n_tile

    # Wrapper-side padding / dtype casts (zero padding is exact for the math:
    # padded hidden/out lanes stay 0 through ReLU and are sliced off).
    x_p = jnp.zeros((B_p, N_p, d_in), compute_dtype).at[:B, :N, :].set(
        x.astype(compute_dtype))
    w1_p = jnp.zeros((d_in, d_hid_p), compute_dtype).at[:, :d_hid].set(
        w1.astype(compute_dtype))
    b1_p = jnp.zeros((1, d_hid_p), f32).at[0, :d_hid].set(b1.astype(f32))
    w2_p = jnp.zeros((d_hid_p, d_out_p), compute_dtype).at[:d_hid, :d_out].set(
        w2.astype(compute_dtype))
    b2_p = jnp.zeros((1, d_out_p), f32).at[0, :d_out].set(b2.astype(f32))

    kernel = _make_kernel(b_tile, n_tile, d_in, d_hid_p, N, N_p, compute_dtype)

    # VMEM budget: double-buffered blocks + f32 intermediates + margin.
    itm = jnp.dtype(compute_dtype).itemsize
    x_blk = b_tile * n_tile * d_in * itm
    w_blk = (d_in * d_hid_p + d_hid_p * d_out_p) * itm + (d_hid_p + d_out_p) * 4
    o_blk = b_tile * d_out_p * 4
    h_blk = b_tile * n_tile * d_hid_p * 4
    acc_blk = b_tile * d_hid_p * 4
    need = 2 * (x_blk + w_blk + o_blk) + h_blk + acc_blk
    vmem_bytes = int(min(max(2 * need + (4 << 20), 32 << 20), 128 << 20))

    cost = pl.CostEstimate(
        flops=2 * B_p * N_p * d_in * d_hid_p + 2 * B_p * d_hid_p * d_out_p,
        transcendentals=0,
        bytes_accessed=int(B_p * N_p * d_in * itm
                           + (d_in * d_hid_p + d_hid_p * d_out_p) * itm
                           + (d_hid_p + d_out_p) * 4
                           + B_p * d_out_p * 4),
    )

    out_padded = pl.pallas_call(
        kernel,
        out_shape=jax.ShapeDtypeStruct((B_p, d_out_p), f32),
        grid_spec=pltpu.PrefetchScalarGridSpec(
            num_scalar_prefetch=0,
            grid=(b_grid, n_grid),
            in_specs=[
                pl.BlockSpec((b_tile, n_tile, d_in), lambda i, k: (i, k, 0)),
                pl.BlockSpec((d_in, d_hid_p), lambda i, k: (0, 0)),
                pl.BlockSpec((1, d_hid_p), lambda i, k: (0, 0)),
                pl.BlockSpec((d_hid_p, d_out_p), lambda i, k: (0, 0)),
                pl.BlockSpec((1, d_out_p), lambda i, k: (0, 0)),
            ],
            out_specs=pl.BlockSpec((b_tile, d_out_p), lambda i, k: (i, 0)),
            scratch_shapes=[pltpu.VMEM((b_tile, d_hid_p), f32)],
        ),
        compiler_params=pltpu.CompilerParams(
            dimension_semantics=("parallel", "arbitrary"),
            vmem_limit_bytes=vmem_bytes,
        ),
        cost_estimate=cost,
    )(x_p, w1_p, b1_p, w2_p, b2_p)

    return out_padded[:B, :d_out]


def init_params(key, enc_net_dims=(2, 4), agg_net_dims=(4, 8)):
    """Deterministic synthetic init mimicking nn.Linear's U(-1/sqrt(fan_in), ...)."""
    d_in, d_hid = enc_net_dims
    d_hid2, d_out = agg_net_dims
    assert d_hid == d_hid2
    k1, k2, k3, k4 = jax.random.split(key, 4)
    lim1 = 1.0 / jnp.sqrt(d_in)
    lim2 = 1.0 / jnp.sqrt(d_hid)
    w1 = jax.random.uniform(k1, (d_in, d_hid), jnp.float32, -lim1, lim1)
    b1 = jax.random.uniform(k2, (d_hid,), jnp.float32, -lim1, lim1)
    w2 = jax.random.uniform(k3, (d_hid, d_out), jnp.float32, -lim2, lim2)
    b2 = jax.random.uniform(k4, (d_out,), jnp.float32, -lim2, lim2)
    return w1, b1, w2, b2


def ref_forward(x, w1, b1, w2, b2, dtype=jnp.float32):
    """Pure-JAX reference of the PyTorch forward, optionally on dtype-rounded inputs."""
    xc = x.astype(dtype).astype(jnp.float32)
    w1c = w1.astype(dtype).astype(jnp.float32)
    w2c = w2.astype(dtype).astype(jnp.float32)
    h = jnp.maximum(jnp.einsum("bnd,dh->bnh", xc, w1c) + b1, 0.0)
    agg = jnp.sum(h, axis=1)
    return jnp.maximum(agg @ w2c + b2, 0.0)


if __name__ == "__main__":
    key = jax.random.PRNGKey(0)
    k_x1, k_p1, k_x2, k_p2 = jax.random.split(key, 4)

    # Case 1: the module's default dims (enc [2, 4], agg [4, 8]), B=2 sets of 8.
    B, N = 2, 8
    enc_dims, agg_dims = (2, 4), (4, 8)
    x = jax.random.normal(k_x1, (B, N, enc_dims[0]), jnp.float32)
    params = init_params(k_p1, enc_dims, agg_dims)
    out = jax.block_until_ready(set_encoder_forward(x, *params))
    assert out.shape == (B, agg_dims[1])
    ref_bf16 = ref_forward(x, *params, dtype=jnp.bfloat16)
    ref_f32 = ref_forward(x, *params)
    assert jnp.allclose(out, ref_bf16, rtol=2e-2, atol=2e-2)
    assert jnp.allclose(out, ref_f32, rtol=1e-1, atol=1e-1)

    # Case 2: exercises multi-chunk set accumulation + N-padding mask.
    B2, N2 = 3, 21
    enc2, agg2 = (5, 32), (32, 16)
    x2 = jax.random.normal(k_x2, (B2, N2, enc2[0]), jnp.float32)
    params2 = init_params(k_p2, enc2, agg2)
    out2 = jax.block_until_ready(
        set_encoder_forward(x2, *params2, b_tile=8, n_tile=8))
    assert out2.shape == (B2, agg2[1])
    ref2_bf16 = ref_forward(x2, *params2, dtype=jnp.bfloat16)
    ref2_f32 = ref_forward(x2, *params2)
    assert jnp.allclose(out2, ref2_bf16, rtol=2e-2, atol=2e-2)
    assert jnp.allclose(out2, ref2_f32, rtol=1e-1, atol=1e-1)

    print("KERNEL_OK")
</pallas_src>

<mosaic_0001>
module attributes {stable_mosaic.version = 11 : i64} {
  func.func @kernel(%arg0: i32, %arg1: i32, %arg2: memref<8x8x2xbf16, #tpu.memory_space<vmem>>, %arg3: memref<2x128xbf16, #tpu.memory_space<vmem>>, %arg4: memref<1x128xf32, #tpu.memory_space<vmem>>, %arg5: memref<128x128xbf16, #tpu.memory_space<vmem>>, %arg6: memref<1x128xf32, #tpu.memory_space<vmem>>, %arg7: memref<8x128xf32, #tpu.memory_space<vmem>>, %arg8: memref<8x128xf32, #tpu.memory_space<vmem>>) attributes {dimension_semantics = [#tpu.dimension_semantics<parallel>, #tpu.dimension_semantics<arbitrary>], iteration_bounds = array<i64: 1, 1>, scalar_prefetch = 0 : i64, scratch_operands = 1 : i64, tpu.core_type = #tpu.core_type<tc>, window_params = [{transform_indices = @transform_0, window_bounds = array<i64: 8, 8, 2>}, {pipeline_mode = #tpu.pipeline_mode<synchronous>, transform_indices = @transform_1, window_bounds = array<i64: 2, 128>}, {pipeline_mode = #tpu.pipeline_mode<synchronous>, transform_indices = @transform_2, window_bounds = array<i64: 1, 128>}, {pipeline_mode = #tpu.pipeline_mode<synchronous>, transform_indices = @transform_3, window_bounds = array<i64: 128, 128>}, {pipeline_mode = #tpu.pipeline_mode<synchronous>, transform_indices = @transform_4, window_bounds = array<i64: 1, 128>}, {transform_indices = @transform_5, window_bounds = array<i64: 8, 128>}]} {
    %c0_i32 = arith.constant 0 : i32
    %0 = arith.cmpi eq, %arg1, %c0_i32 : i32
    %1 = arith.extui %0 : i1 to i32
    %c0_i32_0 = arith.constant 0 : i32
    %2 = arith.cmpi ne, %1, %c0_i32_0 : i32
    scf.if %2 {
      %cst_15 = arith.constant 0.000000e+00 : f32
      %20 = vector.broadcast %cst_15 : f32 to vector<8x128xf32>
      %c0_16 = arith.constant 0 : index
      %c0_17 = arith.constant 0 : index
      %21 = vector.load %arg8[%c0_16, %c0_17] : memref<8x128xf32, #tpu.memory_space<vmem>>, vector<8x128xf32>
      tpu.vector_store %arg8[%c0_16, %c0_17], %20 {strides = array<i32>} : memref<8x128xf32, #tpu.memory_space<vmem>>, vector<8x128xf32>,
    } else {
    }
    %c0 = arith.constant 0 : index
    %c0_1 = arith.constant 0 : index
    %c0_2 = arith.constant 0 : index
    %3 = vector.load %arg2[%c0, %c0_1, %c0_2] : memref<8x8x2xbf16, #tpu.memory_space<vmem>>, vector<8x8x2xbf16>
    %4 = vector.shape_cast %3 : vector<8x8x2xbf16> to vector<64x2xbf16>
    %c0_3 = arith.constant 0 : index
    %c0_4 = arith.constant 0 : index
    %5 = vector.load %arg3[%c0_3, %c0_4] : memref<2x128xbf16, #tpu.memory_space<vmem>>, vector<2x128xbf16>
    %cst = arith.constant dense<0.000000e+00> : vector<64x128xf32>
    %6 = tpu.matmul %4, %5, %cst {dimension_numbers = #tpu.dot_dimension_numbers<[1], [0], [0], [1], [0, 0, 1, 1], [], []>} : vector<64x2xbf16>, vector<2x128xbf16>, vector<64x128xf32> -> vector<64x128xf32>
    %c0_5 = arith.constant 0 : index
    %c0_6 = arith.constant 0 : index
    %7 = vector.load %arg4[%c0_5, %c0_6] : memref<1x128xf32, #tpu.memory_space<vmem>>, vector<1x128xf32>
    %8 = vector.broadcast %7 : vector<1x128xf32> to vector<64x128xf32>
    %9 = arith.addf %6, %8 : vector<64x128xf32>
    %cst_7 = arith.constant 0.000000e+00 : f32
    %10 = vector.broadcast %cst_7 : f32 to vector<64x128xf32>
    %11 = arith.maximumf %9, %10 : vector<64x128xf32>
    %12 = vector.shape_cast %11 : vector<64x128xf32> to vector<8x8x128xf32>
    %c0_8 = arith.constant 0 : index
    %c0_9 = arith.constant 0 : index
    %13 = vector.load %arg8[%c0_8, %c0_9] : memref<8x128xf32, #tpu.memory_space<vmem>>, vector<8x128xf32>
    %cst_10 = arith.constant dense<0.000000e+00> : vector<8x128xf32>
    %14 = vector.multi_reduction <add>, %12, %cst_10 [1] : vector<8x8x128xf32> to vector<8x128xf32>
    %15 = arith.addf %13, %14 : vector<8x128xf32>
    %c0_11 = arith.constant 0 : index
    %c0_12 = arith.constant 0 : index
    %16 = vector.load %arg8[%c0_11, %c0_12] : memref<8x128xf32, #tpu.memory_space<vmem>>, vector<8x128xf32>
    tpu.vector_store %arg8[%c0_11, %c0_12], %15 {strides = array<i32>} : memref<8x128xf32, #tpu.memory_space<vmem>>, vector<8x128xf32>,
    %c0_i32_13 = arith.constant 0 : i32
    %17 = arith.cmpi eq, %arg1, %c0_i32_13 : i32
    %18 = arith.extui %17 : i1 to i32
    %c0_i32_14 = arith.constant 0 : i32
    %19 = arith.cmpi ne, %18, %c0_i32_14 : i32
    scf.if %19 {
      %c0_15 = arith.constant 0 : index
      %c0_16 = arith.constant 0 : index
      %20 = vector.load %arg8[%c0_15, %c0_16] : memref<8x128xf32, #tpu.memory_space<vmem>>, vector<8x128xf32>
      %c0_17 = arith.constant 0 : index
      %c0_18 = arith.constant 0 : index
      %21 = vector.load %arg5[%c0_17, %c0_18] : memref<128x128xbf16, #tpu.memory_space<vmem>>, vector<128x128xbf16>
      %22 = arith.extf %21 : vector<128x128xbf16> to vector<128x128xf32>
      %cst_19 = arith.constant dense<0.000000e+00> : vector<8x128xf32>
      %23 = tpu.matmul %20, %22, %cst_19 {dimension_numbers = #tpu.dot_dimension_numbers<[1], [0], [0], [1], [0, 0, 1, 1], [], []>} : vector<8x128xf32>, vector<128x128xf32>, vector<8x128xf32> -> vector<8x128xf32>
      %c0_20 = arith.constant 0 : index
      %c0_21 = arith.constant 0 : index
      %24 = vector.load %arg6[%c0_20, %c0_21] : memref<1x128xf32, #tpu.memory_space<vmem>>, vector<1x128xf32>
      %25 = vector.broadcast %24 : vector<1x128xf32> to vector<8x128xf32>
      %26 = arith.addf %23, %25 : vector<8x128xf32>
      %cst_22 = arith.constant 0.000000e+00 : f32
      %27 = vector.broadcast %cst_22 : f32 to vector<8x128xf32>
      %28 = arith.maximumf %26, %27 : vector<8x128xf32>
      %c0_23 = arith.constant 0 : index
      %c0_24 = arith.constant 0 : index
      %29 = vector.load %arg7[%c0_23, %c0_24] : memref<8x128xf32, #tpu.memory_space<vmem>>, vector<8x128xf32>
      tpu.vector_store %arg7[%c0_23, %c0_24], %28 {strides = array<i32>} : memref<8x128xf32, #tpu.memory_space<vmem>>, vector<8x128xf32>,
    } else {
    }
    return
  }
  func.func @transform_0(%arg0: i32, %arg1: i32) -> (i32, i32, i32) {
    %c0_i32 = arith.constant 0 : i32
    %c0_i32_0 = arith.constant 0 : i32
    return %arg0, %arg1, %c0_i32 : i32, i32, i32
  }
  func.func @transform_1(%arg0: i32, %arg1: i32) -> (i32, i32) {
    %c0_i32 = arith.constant 0 : i32
    %c0_i32_0 = arith.constant 0 : i32
    %c0_i32_1 = arith.constant 0 : i32
    return %c0_i32, %c0_i32_0 : i32, i32
  }
  func.func @transform_2(%arg0: i32, %arg1: i32) -> (i32, i32) {
    %c0_i32 = arith.constant 0 : i32
    %c0_i32_0 = arith.constant 0 : i32
    %c0_i32_1 = arith.constant 0 : i32
    return %c0_i32, %c0_i32_0 : i32, i32
  }
  func.func @transform_3(%arg0: i32, %arg1: i32) -> (i32, i32) {
    %c0_i32 = arith.constant 0 : i32
    %c0_i32_0 = arith.constant 0 : i32
    %c0_i32_1 = arith.constant 0 : i32
    return %c0_i32, %c0_i32_0 : i32, i32
  }
  func.func @transform_4(%arg0: i32, %arg1: i32) -> (i32, i32) {
    %c0_i32 = arith.constant 0 : i32
    %c0_i32_0 = arith.constant 0 : i32
    %c0_i32_1 = arith.constant 0 : i32
    return %c0_i32, %c0_i32_0 : i32, i32
  }
  func.func @transform_5(%arg0: i32, %arg1: i32) -> (i32, i32) {
    %c0_i32 = arith.constant 0 : i32
    %c0_i32_0 = arith.constant 0 : i32
    return %arg0, %c0_i32 : i32, i32
  }
}

</mosaic_0001>

<bundles_post_ra>
// kernel: tpu_custom_call.1
= control target key start
LH: loop header
LB: loop body
LE: loop exit
PB: predicated region body
PF: predicated region fallthrough
CT: control target
= control target key end

     0   :  { %10 = vsyncpa [#allocation4], 0  ;;  %s653_s0 = inlined_call_operand.vmem [shape: bf16[8,8,2], index: 0, kind: input, shape index: {}]   ;;  %s654_s1 = inlined_call_operand.vmem [shape: bf16[2,128], index: 1, kind: input, shape index: {}]   ;;  %s655_s2 = inlined_call_operand.vmem [shape: f32[1,128], index: 2, kind: input, shape index: {}]   ;;  %s656_s3 = inlined_call_operand.hbm [shape: bf16[128,128], index: 3, kind: input, shape index: {}]   ;;  %s657_s4 = inlined_call_operand.vmem [shape: f32[1,128], index: 4, kind: input, shape index: {}]   ;;  %s658_s5 = inlined_call_operand.hbm [shape: f32[8,128], index: 5, kind: output, shape index: {}]  }
   0x1   :  { %11 = vsyncpa [#allocation5], 0  ;;  %s571_s18 = smov [#allocation3]   ;;  %s523_s22 = scalar_lea.hbm %s656_s3, 1024 }
   0x2   :  { %s23_s19 = sshll.u32 %s571_s18, 4  ;;  %p524_p0 = scmp.ne.s32.totalorder %s656_s3, %s523_s22  ;;  %s24_s19 = int_to_ptr.vmem [resolvable:$true] %s23_s19 }
   0x3   :  { %p527_p1 = scmp.lt.u32.totalorder %s523_s22, %s656_s3 }
   0x5   :  { %p529_p2 = pnand %p527_p1, %p524_p0 }
   0x7   :  { %532 = shalt.err (!%p529_p2)
}
   0x8   :  { %s533_s27 = scalar_lea.vmem %s24_s19, 1024  ;;  %p538_p4 = scmp.lt.s32.totalorder %s24_s19, %s24_s19 }
   0x9   :  { %p534_p3 = scmp.ne.s32.totalorder %s24_s19, %s533_s27  ;;  %p539_p5 = scmp.lt.s32.totalorder %s533_s27, %s533_s27 }
   0xb   :  { %p540_p6 = por %p539_p5, %p538_p4 }
   0xd   :  { %p541_p7 = pnand %p540_p6, %p534_p3 }
   0xf   :  { %544 = shalt.err (!%p541_p7)
}
  0x10   :  { %s572_s28 = smov 64   ;;  %s573_s29 = smov 4  }
  0x11   :  { %29 = dma.hbm_to_vmem [thread:$0]  %s656_s3, 1024, %s24_s19, [#allocation4], %s572_s28, %s572_s28, %s573_s29  }
  0x12   :  { %567 = dma.done.wait [#allocation4], 1024  }
  0x13   :  { %568 = vsyncadd [#allocation4], 4294966272  ;;  %v574_v0 = vmov 0.0|0.0   ;;  %vm90_vm0 = vcmask 1040384   ;;  %vm77_vm1 = vcmask 15360   ;;  %v519_v3 = vld [vmem:[%s653_s0] sm:$0xff]  }
  0x14   :  { %487 = vmatprep.subr.bf16.mxu1 %v574_v0  ;;  %v49_v1 = vld [vmem:[%s654_s1] sm:$0x1]  ;;  %v520_v4 = vld [vmem:[%s653_s0 + $0x8] sm:$0xff]   ;;  %444 = vmatprep.mubr.msk.bf16.mxu0 %vm77_vm1, %v519_v3  ;;  %v521_v5 = vld [vmem:[%s653_s0 + $0x10] sm:$0xff]   ;;  %vm575_vm2 = vmmov 0   ;;  %v576_v15 = vmov 0.0  }
  0x15   :  { %511 = vmatprep.subr.msk.bf16.mxu0 %vm90_vm0, %v49_v1  ;;  %v92_v2 = vsel %vm90_vm0, %v49_v1, 0  ;;  %v522_v6 = vld [vmem:[%s653_s0 + $0x18] sm:$0xff]   ;;  %v382_v7 = vld [vmem:[#allocation3] sm:$0xff]   ;;  %v413_v8 = vld [vmem:[#allocation3 + $0x8] sm:$0xff]   ;;  %484 = vmatprep.mubr.msk.f32.mxu1 %vm575_vm2, %v576_v15  ;;  %vm224_vm3 = vcmask 1041409   ;;  %vm226_vm4 = vcmask 1042434  }
  0x16   :  { %443 = vmatpush3.bf16.msra.mxu0 %v92_v2  ;;  %489 = vmatpush3.bf16.msra.mxu1 %v382_v7  ;;  %v414_v9 = vld [vmem:[#allocation3 + $0x10] sm:$0xff]   ;;  %v415_v10 = vld [vmem:[#allocation3 + $0x18] sm:$0xff]   ;;  %v416_v11 = vld [vmem:[#allocation3 + $0x20] sm:$0xff]   ;;  %vm228_vm5 = vcmask 1043459   ;;  %vm230_vm6 = vcmask 1044484   ;;  %vm232_vm7 = vcmask 1045509  }
  0x17   :  { %490 = vmatprep.subr.bf16.mxu1 %v574_v0  ;;  %v417_v12 = vld [vmem:[#allocation3 + $0x28] sm:$0xff]   ;;  %v418_v13 = vld [vmem:[#allocation3 + $0x30] sm:$0xff]   ;;  %v419_v14 = vld [vmem:[#allocation3 + $0x38] sm:$0xff]   ;;  %vm234_vm8 = vcmask 1046534   ;;  %vm236_vm9 = vcmask 1047559   ;;  %s577_s17 = smov [#allocation6]  }
  0x18   :  { %v371_v16 = vld [vmem:[%s655_s2] ss:$0 sm:$0xff]  ;;  %s362_s18 = sshll.u32 %s577_s17, 4  ;;  %s363_s18 = int_to_ptr.vmem [resolvable:$true] %s362_s18 }
  0x19   :  { %445 = vmatmul.mubr.msk.bf16.vlgmr.msra.gmra.mrb[0].mxu0 %vm77_vm1, %v520_v4  ;;  %s545_s19 = scalar_lea.vmem %s363_s18, 128  ;;  %p550_p9 = scmp.lt.s32.totalorder %s363_s18, %s363_s18 }
  0x1a   :  { %448 = vmatprep.mubr.msk.bf16.mxu0 %vm77_vm1, %v521_v5  ;;  %492 = vmatpush3.bf16.msra.mxu1 %v413_v8  ;;  %p546_p8 = scmp.ne.s32.totalorder %s363_s18, %s545_s19  ;;  %p551_p10 = scmp.lt.s32.totalorder %s545_s19, %s545_s19 }
  0x1b   :  { %493 = vmatprep.subr.bf16.mxu1 %v574_v0 }
  0x1c   :  { %p552_p11 = por %p551_p10, %p550_p9 }
  0x1e   :  { %495 = vmatpush3.bf16.msra.mxu1 %v414_v9  ;;  %p553_p12 = pnand %p552_p11, %p546_p8 }
  0x1f   :  { %496 = vmatprep.subr.bf16.mxu1 %v574_v0 }
  0x21   :  { %449 = vmatmul.mubr.msk.bf16.gmra.mrb[4].mxu0 %vm77_vm1, %v522_v6 }
  0x22   :  { %498 = vmatpush3.bf16.msra.mxu1 %v415_v10 }
  0x23   :  { %499 = vmatprep.subr.bf16.mxu1 %v574_v0 }
  0x26   :  { %501 = vmatpush3.bf16.msra.mxu1 %v416_v11 }
  0x27   :  { %502 = vmatprep.subr.bf16.mxu1 %v574_v0 }
  0x2a   :  { %504 = vmatpush3.bf16.msra.mxu1 %v417_v12 }
  0x2b   :  { %505 = vmatprep.subr.bf16.mxu1 %v574_v0 }
  0x2e   :  { %507 = vmatpush3.bf16.msra.mxu1 %v418_v13 }
  0x2f   :  { %508 = vmatprep.subr.bf16.mxu1 %v574_v0 }
  0x32   :  { %510 = vmatpush3.bf16.msra.mxu1 %v419_v14 }
  0xec   :  { %v446_v17 = vpop.f32.mrb[0].mxu0 }
  0xed   :  { %v137_v18 = vadd.f32 %v446_v17, %v371_v16  ;;  %v128_v19 = vpop.f32.mrb[1].mxu0 }
  0xee   :  { %v129_v20 = vadd.f32 %v371_v16, %v128_v19  ;;  %v447_v21 = vpop.f32.mrb[2].mxu0 }
  0xef   :  { %v161_v22 = vmax.f32 %v137_v18, 0.0  ;;  %v140_v23 = vadd.f32 %v447_v21, %v371_v16  ;;  %v131_v24 = vpop.f32.mrb[3].mxu0 }
  0xf0   :  { %v159_v25 = vmax.f32 %v129_v20, 0.0  ;;  %v132_v26 = vadd.f32 %v371_v16, %v131_v24 }
  0xf1   :  { %v180_v27 = vrot.slane %v161_v22, 4  ;;  %v162_v28 = vmax.f32 %v140_v23, 0.0 }
  0xf2   :  { %v168_v29 = vrot.slane %v159_v25, 4  ;;  %v160_v30 = vmax.f32 %v132_v26, 0.0 }
  0xf3   :  { %v181_v31 = vadd.f32 %v180_v27, %v161_v22  ;;  %v186_v32 = vrot.slane %v162_v28, 4 }
  0xf4   :  { %v169_v33 = vadd.f32 %v168_v29, %v159_v25  ;;  %v174_v34 = vrot.slane %v160_v30, 4  ;;  %v450_v35 = vpop.f32.mrb[4].mxu0 }
  0xf5   :  { %v182_v36 = vrot.slane %v181_v31, 2  ;;  %v187_v37 = vadd.f32 %v186_v32, %v162_v28  ;;  %v153_v38 = vadd.f32 %v450_v35, %v371_v16  ;;  %v144_v39 = vpop.f32.mrb[5].mxu0  ;;  %v380_v32 = vld [vmem:[%s657_s4] ss:$0 sm:$0xff] }
  0xf6   :  { %v170_v40 = vrot.slane %v169_v33, 2  ;;  %v175_v41 = vadd.f32 %v174_v34, %v160_v30  ;;  %v145_v42 = vadd.f32 %v371_v16, %v144_v39  ;;  %v451_v43 = vpop.f32.mrb[6].mxu0 }
  0xf7   :  { %v183_v44 = vadd.f32 %v182_v36, %v181_v31  ;;  %v188_v45 = vrot.slane %v187_v37, 2  ;;  %v165_v46 = vmax.f32 %v153_v38, 0.0  ;;  %v156_v47 = vadd.f32 %v451_v43, %v371_v16  ;;  %v147_v48 = vpop.f32.mrb[7].mxu0 }
  0xf8   :  { %v171_v49 = vadd.f32 %v170_v40, %v169_v33  ;;  %v176_v50 = vrot.slane %v175_v41, 2  ;;  %v163_v51 = vmax.f32 %v145_v42, 0.0  ;;  %v148_v52 = vadd.f32 %v371_v16, %v147_v48 }
  0xf9   :  { %v189_v53 = vadd.f32 %v188_v45, %v187_v37  ;;  %v204_v54 = vrot.slane %v165_v46, 4  ;;  %v166_v55 = vmax.f32 %v156_v47, 0.0  ;;  %v184_v60 = vrot.slane %v183_v44, 1 }
  0xfa   :  { %v172_v56 = vrot.slane %v171_v49, 1  ;;  %v177_v57 = vadd.f32 %v176_v50, %v175_v41  ;;  %v192_v58 = vrot.slane %v163_v51, 4  ;;  %v164_v59 = vmax.f32 %v148_v52, 0.0 }
  0xfb   :  { %v205_v61 = vadd.f32 %v204_v54, %v165_v46  ;;  %v210_v62 = vrot.slane %v166_v55, 4  ;;  %v190_v63 = vrot.slane %v189_v53, 1  ;;  %v185_v9 = vadd.f32 %v184_v60, %v183_v44 }
  0xfc   :  { %v178_v0 = vrot.slane %v177_v57, 1  ;;  %v193_v1 = vadd.f32 %v192_v58, %v163_v51  ;;  %v198_v2 = vrot.slane %v164_v59, 4  ;;  %v173_v5 = vadd.f32 %v172_v56, %v171_v49 }
  0xfd   :  { %v206_v3 = vrot.slane %v205_v61, 2  ;;  %v211_v4 = vadd.f32 %v210_v62, %v166_v55  ;;  %v191_v12 = vadd.f32 %v190_v63, %v189_v53 }
  0xfe   :  { %v179_v6 = vadd.f32 %v178_v0, %v177_v57  ;;  %v194_v7 = vrot.slane %v193_v1, 2  ;;  %v199_v8 = vadd.f32 %v198_v2, %v164_v59 }
  0xff   :  { %v207_v10 = vadd.f32 %v206_v3, %v205_v61  ;;  %v212_v11 = vrot.slane %v211_v4, 2 }
 0x100   :  { %v225_v13 = vsel %vm224_vm3, %v179_v6, %v173_v5  ;;  %v195_v14 = vadd.f32 %v194_v7, %v193_v1  ;;  %v200_v15 = vrot.slane %v199_v8, 2 }
 0x101   :  { %v213_v16 = vadd.f32 %v212_v11, %v211_v4  ;;  %v227_v17 = vsel %vm226_vm4, %v185_v9, %v225_v13  ;;  %v208_v21 = vrot.slane %v207_v10, 1 }
 0x102   :  { %v196_v18 = vrot.slane %v195_v14, 1  ;;  %v201_v19 = vadd.f32 %v200_v15, %v199_v8  ;;  %v229_v20 = vsel %vm228_vm5, %v191_v12, %v227_v17 }
 0x103   :  { %v214_v23 = vrot.slane %v213_v16, 1  ;;  %v209_v27 = vadd.f32 %v208_v21, %v207_v10 }
 0x104   :  { %v197_v22 = vadd.f32 %v196_v18, %v195_v14  ;;  %v202_v24 = vrot.slane %v201_v19, 1 }
 0x105   :  { %v215_v28 = vadd.f32 %v214_v23, %v213_v16 }
 0x106   :  { %v203_v25 = vadd.f32 %v202_v24, %v201_v19  ;;  %v231_v26 = vsel %vm230_vm6, %v197_v22, %v229_v20 }
 0x108   :  { %v233_v29 = vsel %vm232_vm7, %v203_v25, %v231_v26 }
 0x109   :  { %v235_v30 = vsel %vm234_vm8, %v209_v27, %v233_v29 }
 0x10a   :  { %v237_v31 = vsel %vm236_vm9, %v215_v28, %v235_v30 }
 0x10b   :  { %485 = vmatmul.mubr.f32.vlgmr.msra.gmra.mrb[0].mxu1 %v237_v31 }
 0x1de   :  { %v350_v33 = vpop.f32.mrb[0].mxu1 }
 0x1df   :  { %v351_v34 = vadd.f32 %v380_v32, %v350_v33  ;;  %v486_v35 = vpop.f32.mrb[1].mxu1 }
 0x1e1   :  { %v354_v36 = vmax.f32 %v351_v34, 0.0 }
 0x1e3   :  { %355 = vst [vmem:[#allocation6] sm:$0xff] %v354_v36 }
 0x1e4   :  { %556 = shalt.err (!%p553_p12)
}
 0x1e5   :  { %s557_s22 = scalar_lea.hbm %s658_s5, 128 }
 0x1e6   :  { %p558_p13 = scmp.ne.s32.totalorder %s658_s5, %s557_s22  ;;  %p561_p0 = scmp.lt.u32.totalorder %s557_s22, %s658_s5 }
 0x1e8   :  { %p563_p1 = pnand %p561_p0, %p558_p13 }
 0x1ea   :  { %566 = shalt.err (!%p563_p1)
}
 0x1eb   :  { %365 = dma.vmem_to_hbm [thread:$0]  %s363_s18, 128, %s658_s5, [#allocation5]  }
 0x1ec   :  { %569 = dma.done.wait [#allocation5], 128  }
 0x1ed   :  { %570 = vsyncadd [#allocation5], 4294967168 }
 0x1ee   :  { %369 = vsyncpa [#allocation4], 1 }
 0x1ef   :  { %370 = vsyncpa [#allocation5], 1 }

</bundles_post_ra>
